<compile_context>
chip_gen: v7x
topology: tpu7x:2x2x1
jax: 0.10.0
libtpu: 0.0.40
codegen_flags: <defaults>
</compile_context>

<pallas_src>
import functools

import jax
import jax.numpy as jnp
from jax.experimental import pallas as pl
from jax.experimental.pallas import tpu as pltpu


def _rmsnorm_kernel(x_ref, w_ref, o_ref, *, eps):
    # x_ref: (TILE_ROWS, D), w_ref: (1, D), o_ref: (TILE_ROWS, D)
    x = x_ref[...]
    xf = x.astype(jnp.float32)
    # Reduction always in f32 for accuracy.
    ms = jnp.mean(xf * xf, axis=-1, keepdims=True)          # (TILE_ROWS, 1)
    inv = jax.lax.rsqrt(ms + eps)                            # (TILE_ROWS, 1)

    if x.dtype == jnp.float32:
        # f32 path (also the correct choice on v5e, which has no bf16 VALU).
        y = xf * inv * w_ref[...].astype(jnp.float32)
    else:
        # bf16/fp16 path: keep the big (tile, d) multiplies in the input dtype
        # (native on v6e/v7x); only the tiny (tile, 1) inv is cast down.
        y = x * inv.astype(x.dtype) * w_ref[...].astype(x.dtype)

    o_ref[...] = y.astype(o_ref.dtype)


def _vmem_limit_bytes():
    """Scoped-VMEM limit: ~3/4 of physical VMEM, capped at 64 MiB."""
    try:
        cap = pltpu.get_tpu_info().vmem_capacity_bytes
    except Exception:  # pragma: no cover - conservative fallback
        cap = 128 << 20
    return int(min(cap * 3 // 4, 64 << 20))


def _choose_tile_rows(n_rows, d, itemsize, vmem_limit_bytes):
    """Largest row tile whose pipeline footprint fits comfortably in VMEM.

    Footprint per row ~= 2x input buf + 2x output buf (double buffering)
    plus headroom for the f32 temporaries the kernel body materializes.
    """
    if n_rows <= 8:
        return n_rows  # full-extent second-to-last dim is always legal
    bytes_per_row = d * (4 * itemsize + 8)
    tile = (vmem_limit_bytes // 2) // max(bytes_per_row, 1)
    tile = max(8, min(tile, 1024, n_rows))
    return (tile // 8) * 8  # keep sublane (8) alignment


def rms_norm(x, weight, eps=1e-5, tile_rows=None):
    """x: (..., d_model), weight: (d_model,)."""
    orig_shape = x.shape
    d = orig_shape[-1]
    x2d = x.reshape(-1, d)
    n_rows = x2d.shape[0]

    vmem_limit = _vmem_limit_bytes()
    if tile_rows is None:
        tile = _choose_tile_rows(n_rows, d, x2d.dtype.itemsize, vmem_limit)
    else:
        tile = min(tile_rows, n_rows)

    # No host-side padding: Pallas masks the partial final block, and each row
    # is normalized independently so padded read lanes are harmless.
    grid = (pl.cdiv(n_rows, tile),)

    w2d = weight.reshape(1, d)

    kernel = functools.partial(_rmsnorm_kernel, eps=eps)

    out = pl.pallas_call(
        kernel,
        out_shape=jax.ShapeDtypeStruct((n_rows, d), x.dtype),
        grid_spec=pltpu.PrefetchScalarGridSpec(
            num_scalar_prefetch=0,
            grid=grid,
            in_specs=[
                pl.BlockSpec((tile, d), lambda i: (i, 0)),
                pl.BlockSpec((1, d), lambda i: (0, 0)),
            ],
            out_specs=pl.BlockSpec((tile, d), lambda i: (i, 0)),
        ),
        compiler_params=pltpu.CompilerParams(
            dimension_semantics=("parallel",),
            vmem_limit_bytes=vmem_limit,
        ),
    )(x2d, w2d)

    return out.reshape(orig_shape)


def rms_norm_ref(x, weight, eps=1e-5):
    xf = x.astype(jnp.float32)
    ms = jnp.mean(xf * xf, axis=-1, keepdims=True)
    y = xf * jax.lax.rsqrt(ms + eps) * weight.astype(jnp.float32)
    return y.astype(x.dtype)


if __name__ == "__main__":
    key = jax.random.PRNGKey(0)
    batch, seq, d_model = 2, 8, 32
    # NOTE: d_model=32 (< 128 lanes) is only for the small correctness check;
    # real deployments should use d_model that is a multiple of 128 for
    # unmasked lane-dense stores.
    x = jax.random.normal(key, (batch, seq, d_model), dtype=jnp.float32)
    # Deterministic parameter init mirroring nn.Parameter(torch.ones(d_model)).
    weight = jnp.ones((d_model,), dtype=jnp.float32)

    y = jax.block_until_ready(rms_norm(x, weight, eps=1e-5))
    y_ref = rms_norm_ref(x, weight, eps=1e-5)
    assert y.shape == x.shape
    assert jnp.allclose(y, y_ref, atol=1e-5, rtol=1e-5)
    print("KERNEL_OK")
</pallas_src>

<mosaic_0001>
module attributes {stable_mosaic.version = 11 : i64} {
  func.func @_rmsnorm_kernel(%arg0: i32, %arg1: memref<16x32xf32, #tpu.memory_space<vmem>>, %arg2: memref<1x32xf32, #tpu.memory_space<vmem>>, %arg3: memref<16x32xf32, #tpu.memory_space<vmem>>) attributes {dimension_semantics = [#tpu.dimension_semantics<parallel>], iteration_bounds = array<i64: 1>, scalar_prefetch = 0 : i64, scratch_operands = 0 : i64, tpu.core_type = #tpu.core_type<tc>, window_params = [{transform_indices = @transform_0, window_bounds = array<i64: 16, 32>}, {pipeline_mode = #tpu.pipeline_mode<synchronous>, transform_indices = @transform_1, window_bounds = array<i64: 1, 32>}, {transform_indices = @transform_2, window_bounds = array<i64: 16, 32>}]} {
    %c0 = arith.constant 0 : index
    %c0_0 = arith.constant 0 : index
    %0 = vector.load %arg1[%c0, %c0_0] : memref<16x32xf32, #tpu.memory_space<vmem>>, vector<16x32xf32>
    %1 = arith.mulf %0, %0 : vector<16x32xf32>
    %cst = arith.constant dense<0.000000e+00> : vector<16xf32>
    %2 = vector.multi_reduction <add>, %1, %cst [1] : vector<16x32xf32> to vector<16xf32>
    %3 = vector.shape_cast %2 : vector<16xf32> to vector<16x1xf32>
    %cst_1 = arith.constant 3.200000e+01 : f32
    %4 = vector.broadcast %cst_1 : f32 to vector<16x1xf32>
    %5 = arith.divf %3, %4 : vector<16x1xf32>
    %cst_2 = arith.constant 9.99999974E-6 : f32
    %6 = vector.broadcast %cst_2 : f32 to vector<16x1xf32>
    %7 = arith.addf %5, %6 : vector<16x1xf32>
    %8 = math.rsqrt %7 : vector<16x1xf32>
    %9 = vector.broadcast %8 : vector<16x1xf32> to vector<16x32xf32>
    %10 = arith.mulf %0, %9 : vector<16x32xf32>
    %c0_3 = arith.constant 0 : index
    %c0_4 = arith.constant 0 : index
    %11 = vector.load %arg2[%c0_3, %c0_4] : memref<1x32xf32, #tpu.memory_space<vmem>>, vector<1x32xf32>
    %12 = vector.broadcast %11 : vector<1x32xf32> to vector<16x32xf32>
    %13 = arith.mulf %10, %12 : vector<16x32xf32>
    %c0_5 = arith.constant 0 : index
    %c0_6 = arith.constant 0 : index
    %14 = vector.load %arg3[%c0_5, %c0_6] : memref<16x32xf32, #tpu.memory_space<vmem>>, vector<16x32xf32>
    tpu.vector_store %arg3[%c0_5, %c0_6], %13 {strides = array<i32>} : memref<16x32xf32, #tpu.memory_space<vmem>>, vector<16x32xf32>,
    return
  }
  func.func @transform_0(%arg0: i32) -> (i32, i32) {
    %c0_i32 = arith.constant 0 : i32
    %c0_i32_0 = arith.constant 0 : i32
    return %arg0, %c0_i32 : i32, i32
  }
  func.func @transform_1(%arg0: i32) -> (i32, i32) {
    %c0_i32 = arith.constant 0 : i32
    %c0_i32_0 = arith.constant 0 : i32
    %c0_i32_1 = arith.constant 0 : i32
    return %c0_i32, %c0_i32_0 : i32, i32
  }
  func.func @transform_2(%arg0: i32) -> (i32, i32) {
    %c0_i32 = arith.constant 0 : i32
    %c0_i32_0 = arith.constant 0 : i32
    return %arg0, %c0_i32 : i32, i32
  }
}

</mosaic_0001>

<bundles_post_ra>
// kernel: tpu_custom_call.1
= control target key start
LH: loop header
LB: loop body
LE: loop exit
PB: predicated region body
PF: predicated region fallthrough
CT: control target
= control target key end

     0   :  { %7 = vsyncpa [#allocation3], 0  ;;  %s235_s0 = inlined_call_operand.hbm [shape: f32[16,32], index: 0, kind: input, shape index: {}]   ;;  %s236_s1 = inlined_call_operand.hbm [shape: f32[1,32], index: 1, kind: input, shape index: {}]   ;;  %s237_s2 = inlined_call_operand.hbm [shape: f32[16,32], index: 2, kind: output, shape index: {}]  }
   0x1   :  { %8 = vsyncpa [#allocation6], 0 }
   0x2   :  { %9 = vsyncpa [#allocation4], 0  ;;  %s169_s9 = smov [#allocation2]   ;;  %s97_s13 = scalar_lea.hbm %s235_s0, 256 }
   0x3   :  { %s15_s10 = sshll.u32 %s169_s9, 4  ;;  %p98_p0 = scmp.ne.s32.totalorder %s235_s0, %s97_s13  ;;  %s16_s10 = int_to_ptr.vmem [resolvable:$true] %s15_s10 }
   0x4   :  { %p101_p1 = scmp.lt.u32.totalorder %s97_s13, %s235_s0 }
   0x6   :  { %p103_p2 = pnand %p101_p1, %p98_p0 }
   0x8   :  { %106 = shalt.err (!%p103_p2)
}
   0x9   :  { %s107_s18 = scalar_lea.vmem %s16_s10, 256  ;;  %p112_p4 = scmp.lt.s32.totalorder %s16_s10, %s16_s10 }
   0xa   :  { %p108_p3 = scmp.ne.s32.totalorder %s16_s10, %s107_s18  ;;  %p113_p5 = scmp.lt.s32.totalorder %s107_s18, %s107_s18 }
   0xc   :  { %p114_p6 = por %p113_p5, %p112_p4 }
   0xe   :  { %p115_p7 = pnand %p114_p6, %p108_p3 }
  0x10   :  { %118 = shalt.err (!%p115_p7)
}
  0x11   :  { %s170_s19 = smov 128   ;;  %s171_s20 = smov 8  }
  0x12   :  { %21 = dma.hbm_to_vmem [thread:$0]  %s235_s0, 256, %s16_s10, [#allocation3], %s170_s19, %s170_s19, %s171_s20  }
  0x13   :  { %s172_s23 = smov [#allocation5]   ;;  %s119_s27 = scalar_lea.hbm %s236_s1, 16 }
  0x14   :  { %s28_s24 = sshll.u32 %s172_s23, 4  ;;  %p120_p8 = scmp.ne.s32.totalorder %s236_s1, %s119_s27  ;;  %s29_s24 = int_to_ptr.vmem [resolvable:$true] %s28_s24 }
  0x15   :  { %p123_p9 = scmp.lt.u32.totalorder %s119_s27, %s236_s1 }
  0x17   :  { %p125_p10 = pnand %p123_p9, %p120_p8 }
  0x19   :  { %128 = shalt.err (!%p125_p10)
}
  0x1a   :  { %s129_s4 = scalar_lea.vmem %s29_s24, 16  ;;  %s133_s0 = scalar_lea.vmem %s29_s24, 32 }
  0x1b   :  { %p130_p11 = scmp.ne.s32.totalorder %s29_s24, %s129_s4  ;;  %p134_p12 = scmp.lt.s32.totalorder %s29_s24, %s29_s24 }
  0x1c   :  { %p135_p13 = scmp.lt.s32.totalorder %s133_s0, %s129_s4 }
  0x1e   :  { %p136_p0 = por %p135_p13, %p134_p12 }
  0x20   :  { %p137_p1 = pnand %p136_p0, %p130_p11 }
  0x22   :  { %140 = shalt.err (!%p137_p1)
}
  0x23   :  { %31 = dma.hbm_to_vmem [thread:$0]  %s236_s1, 16, %s29_s24, [#allocation6]  }
  0x24   :  { %163 = dma.done.wait [#allocation3], 256  }
  0x25   :  { %164 = vsyncadd [#allocation3], 4294967040 }
  0x26   :  { %165 = dma.done.wait [#allocation6], 16  }
  0x27   :  { %166 = vsyncadd [#allocation6], 4294967280  ;;  %v38_v0 = vld [vmem:[#allocation2] sm:$0xff]  ;;  %vm42_vm0 = vcmask 261120   ;;  %v39_v1 = vld [vmem:[#allocation2 + $0x8] sm:$0xff]  ;;  %s173_s1 = smov [#allocation7]  }
  0x28   :  { %v40_v2 = vmul.f32 %v38_v0, %v38_v0  ;;  %v41_v3 = vmul.f32 %v39_v1, %v39_v1  ;;  %v87_v13 = vld [vmem:[#allocation5] ss:$0 sm:$0xff]  ;;  %s74_s7 = sshll.u32 %s173_s1, 4  ;;  %s75_s7 = int_to_ptr.vmem [resolvable:$true] %s74_s7 }
  0x29   :  { %s141_s8 = scalar_lea.vmem %s75_s7, 256  ;;  %p146_p3 = scmp.lt.s32.totalorder %s75_s7, %s75_s7 }
  0x2a   :  { %v43_v4 = vsel %vm42_vm0, %v40_v2, 0.0  ;;  %v46_v5 = vsel %vm42_vm0, %v41_v3, 0.0  ;;  %p142_p2 = scmp.ne.s32.totalorder %s75_s7, %s141_s8  ;;  %p147_p4 = scmp.lt.s32.totalorder %s141_s8, %s141_s8 }
  0x2b   :  { %44 = vadd.xlane.f32.xlu0 %v43_v4 }
  0x2c   :  { %p148_p5 = por %p147_p4, %p146_p3 }
  0x2e   :  { %p149_p6 = pnand %p148_p5, %p142_p2 }
  0x2f   :  { %47 = vadd.xlane.f32.xlu0 %v46_v5 }
  0xb8   :  { %v45_v6 = vpop.xlane.xlu0 %44 }
  0xb9   :  { %v50_v7 = vmul.f32 0.03125, %v45_v6 }
  0xbb   :  { %v52_v8 = vadd.f32 1e-05, %v50_v7 }
  0xbc   :  { %v48_v9 = vpop.xlane.xlu0 %47 }
  0xbd   :  { %93 = vrsqrt.f32 %v52_v8  ;;  %v51_v10 = vmul.f32 0.03125, %v48_v9 }
  0xbf   :  { %v53_v11 = vadd.f32 1e-05, %v51_v10 }
  0xc1   :  { %95 = vrsqrt.f32 %v53_v11 }
  0xc7   :  { %v94_v12 = vpop.eup %93 }
  0xc8   :  { %v56_v14 = vmul.f32 %v94_v12, %v38_v0 }
  0xca   :  { %v65_v15 = vmul.f32 %v87_v13, %v56_v14 }
  0xcb   :  { %v96_v16 = vpop.eup %95 }
  0xcc   :  { %v57_v17 = vmul.f32 %v96_v16, %v39_v1  ;;  %67 = vst.msk [vmem:[#allocation7] sm:$0xff] %vm42_vm0, %v65_v15 }
  0xce   :  { %v66_v18 = vmul.f32 %v87_v13, %v57_v17 }
  0xd0   :  { %68 = vst.msk [vmem:[#allocation7 + $0x8] sm:$0xff] %vm42_vm0, %v66_v18 }
  0xd1   :  { %152 = shalt.err (!%p149_p6)
}
  0xd2   :  { %s153_s11 = scalar_lea.hbm %s237_s2, 256 }
  0xd3   :  { %p154_p7 = scmp.ne.s32.totalorder %s237_s2, %s153_s11  ;;  %p157_p8 = scmp.lt.u32.totalorder %s153_s11, %s237_s2 }
  0xd5   :  { %p159_p9 = pnand %p157_p8, %p154_p7 }
  0xd7   :  { %162 = shalt.err (!%p159_p9)
}
  0xd8   :  { %80 = dma.vmem_to_hbm [thread:$0]  %s75_s7, 256, %s237_s2, [#allocation4], %s170_s19, %s170_s19, %s171_s20  }
  0xd9   :  { %167 = dma.done.wait [#allocation4], 256  }
  0xda   :  { %168 = vsyncadd [#allocation4], 4294967040 }
  0xdb   :  { %84 = vsyncpa [#allocation3], 1 }
  0xdc   :  { %85 = vsyncpa [#allocation6], 1 }
  0xdd   :  { %86 = vsyncpa [#allocation4], 1 }

</bundles_post_ra>
